<compile_context>
chip_gen: v7x
topology: tpu7x:2x2x1
jax: 0.10.0
libtpu: 0.0.40
codegen_flags: <defaults>
</compile_context>

<pallas_src>
import functools

import jax
import jax.numpy as jnp
from jax.experimental import pallas as pl
from jax.experimental.pallas import tpu as pltpu


# ---------------------------------------------------------------------------
# Generation-aware VMEM budget.
# ---------------------------------------------------------------------------
@functools.lru_cache(maxsize=None)
def _vmem_limit_bytes():
    """~75% of physical VMEM, capped at 100 MiB (96 MiB v5e/v6e, 48 MiB v7x)."""
    try:
        cap = int(pltpu.get_tpu_info().vmem_capacity_bytes)
    except Exception:  # non-TPU tracing / older API -> assume 128 MiB class
        cap = 128 * 1024 * 1024
    return min((cap * 3) // 4, 100 * 1024 * 1024)


def _compiler_params():
    return pltpu.CompilerParams(
        dimension_semantics=("parallel",),
        vmem_limit_bytes=_vmem_limit_bytes())


# ---------------------------------------------------------------------------
# Kernel A: ConvTranspose2d(k=2, s=2).  kernel == stride -> no overlap, so the
# whole op is two matmuls (one per output-row parity ki); weight columns are
# pre-ordered (kj, co) so the stored layout (H, 2, W, 2*Cout) reinterprets for
# free (dim-merge reshape) as the upsampled (2H, 2W, Cout) image.
# ---------------------------------------------------------------------------
def _upconv_kernel(x_ref, w_ref, b_ref, o_ref):
    # x_ref: (1, H*W, Cin) bf16   w_ref: (2, Cin, 2*Cout) bf16   b_ref: (1, 2*Cout) f32
    # o_ref: (1, H, 2, W, 2*Cout) bf16;  o[0,h,ki,w,kj*Cout+co] = up[2h+ki, 2w+kj, co]
    _, H, _, W, C2 = o_ref.shape
    x2 = x_ref[0]                                            # (H*W, Cin) bf16
    for ki in range(2):
        y = jnp.dot(x2, w_ref[ki], preferred_element_type=jnp.float32)
        y = y + b_ref[...]                                   # f32 bias add
        o_ref[0, :, ki, :, :] = y.reshape(H, W, C2).astype(o_ref.dtype)


def upconv_2x2(x_flat, H, W, w, b):
    """x_flat: (N, H*W, Cin) bf16; w: (Cin, Cout, 2, 2) torch layout; b: (Cout,).
    Returns the upsampled activation (N, 2H, 2W, Cout) bf16."""
    N, _, Cin = x_flat.shape
    Cout = w.shape[1]
    # w_k[ki, ci, kj*Cout + co] = w[ci, co, ki, kj]
    w_k = jnp.transpose(w, (2, 0, 3, 1)).reshape(2, Cin, 2 * Cout).astype(jnp.bfloat16)
    b_k = jnp.tile(b, 2).reshape(1, 2 * Cout).astype(jnp.float32)
    y = pl.pallas_call(
        _upconv_kernel,
        out_shape=jax.ShapeDtypeStruct((N, H, 2, W, 2 * Cout), jnp.bfloat16),
        grid_spec=pltpu.PrefetchScalarGridSpec(
            num_scalar_prefetch=0,
            grid=(N,),
            in_specs=[
                pl.BlockSpec((1, H * W, Cin), lambda n: (n, 0, 0)),
                pl.BlockSpec((2, Cin, 2 * Cout), lambda n: (0, 0, 0)),
                pl.BlockSpec((1, 2 * Cout), lambda n: (0, 0)),
            ],
            out_specs=pl.BlockSpec((1, H, 2, W, 2 * Cout),
                                   lambda n: (n, 0, 0, 0, 0)),
        ),
        compiler_params=_compiler_params(),
    )(x_flat, w_k, b_k)
    # Free dim-merge/split reshape (no transpose): (N,H,2,W,2C) -> (N,2H,2W,C).
    return y.reshape(N, 2 * H, 2 * W, Cout)


# ---------------------------------------------------------------------------
# Kernel B: fused  crop + concat + (Conv3x3 + ReLU) x 2   (the `Block`)
# ---------------------------------------------------------------------------
def _block_kernel(up_ref, enc_ref, w1u_ref, w1e_ref, b1_ref, w2_ref, b2_ref,
                  o_ref, *, top, left, per_kh):
    # up_ref:  (1, H2, W2, C) bf16       (upsampled activation)
    # enc_ref: (1, He, We, C) bf16       (full encoder feature; crop = static slice)
    # w1u/w1e/w2: (9*C, C) bf16 im2col weights, rows ordered ((kh*3+kw)*C + ci)
    # b1/b2: (1, C) f32
    # o_ref: (1, OH2*OW2, C) bf16
    _, H2, W2, C = up_ref.shape
    OH1, OW1 = H2 - 2, W2 - 2
    OH2, OW2 = OH1 - 2, OW1 - 2

    # bf16 operands end to end (no full-tile f32 upcast); f32 only in MXU acc.
    up = up_ref[0]                                            # (H2, W2, C) bf16
    enc = enc_ref[0, top:top + H2, left:left + W2, :]         # fused CenterCrop

    def conv3x3(img, w_ref, oh, ow):
        # Valid 3x3 conv of `img` ((oh+2, ow+2, cin) bf16) against im2col
        # weight ref whose rows are ordered ((kh*3+kw)*cin + ci).  Returns
        # the f32 accumulator (oh*ow, Cout).
        cin = img.shape[-1]
        if not per_kh:
            # one lane-concat + one sublane-merge reshape + one K=9C matmul
            cols = [img[kh:kh + oh, kw:kw + ow, :]
                    for kh in range(3) for kw in range(3)]
            p = jnp.concatenate(cols, axis=-1).reshape(oh * ow, 9 * cin)
            return jnp.dot(p, w_ref[...], preferred_element_type=jnp.float32)
        # Large-C path: per-kh accumulation bounds the live patch to 3C cols.
        acc = None
        for kh in range(3):
            cols = [img[kh:kh + oh, kw:kw + ow, :] for kw in range(3)]
            p = jnp.concatenate(cols, axis=-1).reshape(oh * ow, 3 * cin)
            t = jnp.dot(p, w_ref[kh * 3 * cin:(kh + 1) * 3 * cin, :],
                        preferred_element_type=jnp.float32)
            acc = t if acc is None else acc + t
        return acc

    # conv1 over concat([up, crop(enc)], channel) == up-part + enc-part.
    acc1 = conv3x3(up, w1u_ref, OH1, OW1) + conv3x3(enc, w1e_ref, OH1, OW1)
    h1 = jnp.maximum(acc1 + b1_ref[...], 0.0)                 # f32 bias + ReLU
    h1 = h1.astype(jnp.bfloat16).reshape(OH1, OW1, C)         # stays in VMEM/vregs

    # conv2 + ReLU
    acc2 = conv3x3(h1, w2_ref, OH2, OW2)
    o_ref[0] = jnp.maximum(acc2 + b2_ref[...], 0.0).astype(o_ref.dtype)


def fused_block(up, enc, w1, b1, w2, b2, top, left, per_kh=None):
    """up: (N, H2, W2, C) bf16; enc: (N, He, We, C) bf16 (uncropped).
    w1: (C, 2C, 3, 3), w2: (C, C, 3, 3) torch layouts.
    Returns (N, (H2-4)*(W2-4), C) bf16 (spatial flattened)."""
    N, H2, W2, C = up.shape
    He, We = enc.shape[1], enc.shape[2]
    OH1, OW1 = H2 - 2, W2 - 2
    OH2, OW2 = OH1 - 2, OW1 - 2
    if per_kh is None:
        per_kh = C >= 256        # bound patch-matrix width for wide channels
    # im2col weights: row ((kh*3+kw)*C + ci), col co.  Split along C_in to fuse concat.
    w1u = jnp.transpose(w1[:, :C], (2, 3, 1, 0)).reshape(9 * C, C).astype(jnp.bfloat16)
    w1e = jnp.transpose(w1[:, C:], (2, 3, 1, 0)).reshape(9 * C, C).astype(jnp.bfloat16)
    w2k = jnp.transpose(w2, (2, 3, 1, 0)).reshape(9 * C, C).astype(jnp.bfloat16)
    b1k = b1.reshape(1, C).astype(jnp.float32)
    b2k = b2.reshape(1, C).astype(jnp.float32)
    kernel = functools.partial(_block_kernel, top=top, left=left, per_kh=per_kh)
    return pl.pallas_call(
        kernel,
        out_shape=jax.ShapeDtypeStruct((N, OH2 * OW2, C), jnp.bfloat16),
        grid_spec=pltpu.PrefetchScalarGridSpec(
            num_scalar_prefetch=0,
            grid=(N,),
            in_specs=[
                pl.BlockSpec((1, H2, W2, C), lambda n: (n, 0, 0, 0)),
                pl.BlockSpec((1, He, We, C), lambda n: (n, 0, 0, 0)),
                pl.BlockSpec((9 * C, C), lambda n: (0, 0)),
                pl.BlockSpec((9 * C, C), lambda n: (0, 0)),
                pl.BlockSpec((1, C), lambda n: (0, 0)),
                pl.BlockSpec((9 * C, C), lambda n: (0, 0)),
                pl.BlockSpec((1, C), lambda n: (0, 0)),
            ],
            out_specs=pl.BlockSpec((1, OH2 * OW2, C), lambda n: (n, 0, 0)),
        ),
        compiler_params=_compiler_params(),
    )(up, enc, w1u, w1e, b1k, w2k, b2k)


# ---------------------------------------------------------------------------
# Decoder: parameter init (deterministic) + forward (matches Decoder.forward)
# ---------------------------------------------------------------------------
def init_decoder_params(key, chs):
    params = []
    for i in range(len(chs) - 1):
        cin, cout = chs[i], chs[i + 1]
        key, k0, k1, k2, k3, k4, k5 = jax.random.split(key, 7)
        params.append(dict(
            up_w=0.1 * jax.random.normal(k0, (cin, cout, 2, 2), jnp.float32),
            up_b=0.1 * jax.random.normal(k1, (cout,), jnp.float32),
            c1_w=0.1 * jax.random.normal(k2, (cout, cin, 3, 3), jnp.float32),
            c1_b=0.1 * jax.random.normal(k3, (cout,), jnp.float32),
            c2_w=0.1 * jax.random.normal(k4, (cout, cout, 3, 3), jnp.float32),
            c2_b=0.1 * jax.random.normal(k5, (cout,), jnp.float32),
        ))
    return params


def decoder_forward(params, x_nchw, encoder_features_nchw, per_kh=None):
    """x and encoder_features are NCHW like PyTorch; output is NCHW f32."""
    N, C0, H, W = x_nchw.shape
    x = jnp.transpose(x_nchw, (0, 2, 3, 1)).astype(jnp.bfloat16).reshape(N, H * W, C0)
    # Hoisted out of the stage loop; a producer that already emits NHWC could
    # hand these over directly and skip the transposes entirely.
    enc_nhwc = [jnp.transpose(e, (0, 2, 3, 1)).astype(jnp.bfloat16)
                for e in encoder_features_nchw]
    for i, p in enumerate(params):
        up = upconv_2x2(x, H, W, p["up_w"], p["up_b"])        # (N, 2H, 2W, Cout) bf16
        H2, W2 = 2 * H, 2 * W
        enc = enc_nhwc[i]
        He, We = enc.shape[1], enc.shape[2]
        top = int(round((He - H2) / 2.0))                     # torchvision CenterCrop
        left = int(round((We - W2) / 2.0))                    # (banker's rounding on .5)
        x = fused_block(up, enc, p["c1_w"], p["c1_b"], p["c2_w"], p["c2_b"],
                        top, left, per_kh=per_kh)
        H, W = H2 - 4, W2 - 4                                 # after two valid 3x3 convs
    out = x.reshape(N, H, W, -1).astype(jnp.float32)
    return jnp.transpose(out, (0, 3, 1, 2))                   # back to NCHW


# ---------------------------------------------------------------------------
# Pure-JAX reference (NCHW).  Mirrors the kernel's bf16 quantization points
# (inputs / weights / stage hand-offs) so the comparison is tight.
# ---------------------------------------------------------------------------
def _q(t):
    return t.astype(jnp.bfloat16).astype(jnp.float32)


def _ref_upconv(x, w, b):
    y = jnp.einsum('ncij,cdkl->ndijkl', x, _q(w))             # f32 accumulate
    N, Co, H, W, _, _ = y.shape
    y = jnp.transpose(y, (0, 1, 2, 4, 3, 5)).reshape(N, Co, 2 * H, 2 * W)
    return _q(y + b[None, :, None, None])                     # kernel stores bf16


def _ref_conv3_relu(x, w, b):
    OH, OW = x.shape[2] - 2, x.shape[3] - 2
    acc = jnp.zeros((x.shape[0], w.shape[0], OH, OW), jnp.float32) + b[None, :, None, None]
    wq = _q(w)
    for kh in range(3):
        for kw in range(3):
            acc = acc + jnp.einsum('ncij,dc->ndij',
                                   x[:, :, kh:kh + OH, kw:kw + OW], wq[:, :, kh, kw])
    return jnp.maximum(acc, 0.0)


def ref_decoder(params, x, enc_feats):
    x = _q(x)
    for i, p in enumerate(params):
        x = _ref_upconv(x, p["up_w"], p["up_b"])
        e = _q(enc_feats[i])
        Hc, Wc = x.shape[2], x.shape[3]
        He, We = e.shape[2], e.shape[3]
        top, left = int(round((He - Hc) / 2.0)), int(round((We - Wc) / 2.0))
        e = e[:, :, top:top + Hc, left:left + Wc]
        xc = jnp.concatenate([x, e], axis=1)
        h1 = _q(_ref_conv3_relu(xc, p["c1_w"], p["c1_b"]))    # conv2 sees bf16 operands
        x = _q(_ref_conv3_relu(h1, p["c2_w"], p["c2_b"]))     # kernel stores bf16
    return x


if __name__ == "__main__":
    # Small decoder: chs = (32, 16, 8), batch = 2 (chs[i] == 2*chs[i+1] as in UNet)
    chs = (32, 16, 8)
    N = 2
    key = jax.random.PRNGKey(0)
    key, kx, ke0, ke1 = jax.random.split(key, 4)

    x = jax.random.normal(kx, (N, chs[0], 4, 4), jnp.float32)           # NCHW
    encoder_features = [
        jax.random.normal(ke0, (N, chs[1], 12, 12), jnp.float32),       # cropped to 8x8
        jax.random.normal(ke1, (N, chs[2], 10, 10), jnp.float32),       # cropped to 8x8
    ]
    params = init_decoder_params(jax.random.PRNGKey(42), chs)

    ref = jax.block_until_ready(ref_decoder(params, x, encoder_features))

    # Default path (single im2col matmul per conv, K = 9C).
    out = jax.block_until_ready(decoder_forward(params, x, encoder_features))
    assert out.shape == (N, chs[-1], 4, 4), out.shape
    err = float(jnp.max(jnp.abs(out - ref)))
    assert err < 5e-2, err

    # Also exercise the large-C code path (per-kh accumulation, K = 3C).
    out_kh = jax.block_until_ready(
        decoder_forward(params, x, encoder_features, per_kh=True))
    err_kh = float(jnp.max(jnp.abs(out_kh - ref)))
    assert err_kh < 5e-2, err_kh

    print("KERNEL_OK")
</pallas_src>

<mosaic_0001>
module attributes {stable_mosaic.version = 11 : i64} {
  func.func @_upconv_kernel(%arg0: i32, %arg1: memref<1x16x32xbf16, #tpu.memory_space<vmem>>, %arg2: memref<2x32x32xbf16, #tpu.memory_space<vmem>>, %arg3: memref<1x32xf32, #tpu.memory_space<vmem>>, %arg4: memref<1x4x2x4x32xbf16, #tpu.memory_space<vmem>>) attributes {dimension_semantics = [#tpu.dimension_semantics<parallel>], iteration_bounds = array<i64: 2>, scalar_prefetch = 0 : i64, scratch_operands = 0 : i64, tpu.core_type = #tpu.core_type<tc>, window_params = [{transform_indices = @transform_0, window_bounds = array<i64: 1, 16, 32>}, {pipeline_mode = #tpu.pipeline_mode<synchronous>, transform_indices = @transform_1, window_bounds = array<i64: 2, 32, 32>}, {pipeline_mode = #tpu.pipeline_mode<synchronous>, transform_indices = @transform_2, window_bounds = array<i64: 1, 32>}, {transform_indices = @transform_3, window_bounds = array<i64: 1, 4, 2, 4, 32>}]} {
    %c0 = arith.constant 0 : index
    %c0_0 = arith.constant 0 : index
    %c0_1 = arith.constant 0 : index
    %0 = vector.load %arg1[%c0, %c0_0, %c0_1] : memref<1x16x32xbf16, #tpu.memory_space<vmem>>, vector<1x16x32xbf16>
    %1 = vector.shape_cast %0 : vector<1x16x32xbf16> to vector<16x32xbf16>
    %c0_2 = arith.constant 0 : index
    %c0_3 = arith.constant 0 : index
    %c0_4 = arith.constant 0 : index
    %2 = vector.load %arg2[%c0_2, %c0_3, %c0_4] : memref<2x32x32xbf16, #tpu.memory_space<vmem>>, vector<1x32x32xbf16>
    %3 = vector.shape_cast %2 : vector<1x32x32xbf16> to vector<32x32xbf16>
    %cst = arith.constant dense<0.000000e+00> : vector<16x32xf32>
    %4 = tpu.matmul %1, %3, %cst {dimension_numbers = #tpu.dot_dimension_numbers<[1], [0], [0], [1], [0, 0, 1, 1], [], []>} : vector<16x32xbf16>, vector<32x32xbf16>, vector<16x32xf32> -> vector<16x32xf32>
    %c0_5 = arith.constant 0 : index
    %c0_6 = arith.constant 0 : index
    %5 = vector.load %arg3[%c0_5, %c0_6] : memref<1x32xf32, #tpu.memory_space<vmem>>, vector<1x32xf32>
    %6 = vector.broadcast %5 : vector<1x32xf32> to vector<16x32xf32>
    %7 = arith.addf %4, %6 : vector<16x32xf32>
    %8 = vector.shape_cast %7 : vector<16x32xf32> to vector<4x4x32xf32>
    %9 = arith.truncf %8 : vector<4x4x32xf32> to vector<4x4x32xbf16>
    %c0_7 = arith.constant 0 : index
    %c0_8 = arith.constant 0 : index
    %c0_9 = arith.constant 0 : index
    %c0_10 = arith.constant 0 : index
    %c0_11 = arith.constant 0 : index
    %10 = vector.load %arg4[%c0_7, %c0_8, %c0_9, %c0_10, %c0_11] : memref<1x4x2x4x32xbf16, #tpu.memory_space<vmem>>, vector<1x4x1x4x32xbf16>
    %11 = vector.shape_cast %10 : vector<1x4x1x4x32xbf16> to vector<4x4x32xbf16>
    %12 = vector.shape_cast %9 : vector<4x4x32xbf16> to vector<1x4x1x4x32xbf16>
    tpu.vector_store %arg4[%c0_7, %c0_8, %c0_9, %c0_10, %c0_11], %12 {strides = array<i32>} : memref<1x4x2x4x32xbf16, #tpu.memory_space<vmem>>, vector<1x4x1x4x32xbf16>,
    %c1 = arith.constant 1 : index
    %c0_12 = arith.constant 0 : index
    %c0_13 = arith.constant 0 : index
    %13 = vector.load %arg2[%c1, %c0_12, %c0_13] : memref<2x32x32xbf16, #tpu.memory_space<vmem>>, vector<1x32x32xbf16>
    %14 = vector.shape_cast %13 : vector<1x32x32xbf16> to vector<32x32xbf16>
    %cst_14 = arith.constant dense<0.000000e+00> : vector<16x32xf32>
    %15 = tpu.matmul %1, %14, %cst_14 {dimension_numbers = #tpu.dot_dimension_numbers<[1], [0], [0], [1], [0, 0, 1, 1], [], []>} : vector<16x32xbf16>, vector<32x32xbf16>, vector<16x32xf32> -> vector<16x32xf32>
    %c0_15 = arith.constant 0 : index
    %c0_16 = arith.constant 0 : index
    %16 = vector.load %arg3[%c0_15, %c0_16] : memref<1x32xf32, #tpu.memory_space<vmem>>, vector<1x32xf32>
    %17 = vector.broadcast %16 : vector<1x32xf32> to vector<16x32xf32>
    %18 = arith.addf %15, %17 : vector<16x32xf32>
    %19 = vector.shape_cast %18 : vector<16x32xf32> to vector<4x4x32xf32>
    %20 = arith.truncf %19 : vector<4x4x32xf32> to vector<4x4x32xbf16>
    %c0_17 = arith.constant 0 : index
    %c0_18 = arith.constant 0 : index
    %c1_19 = arith.constant 1 : index
    %c0_20 = arith.constant 0 : index
    %c0_21 = arith.constant 0 : index
    %21 = vector.load %arg4[%c0_17, %c0_18, %c1_19, %c0_20, %c0_21] : memref<1x4x2x4x32xbf16, #tpu.memory_space<vmem>>, vector<1x4x1x4x32xbf16>
    %22 = vector.shape_cast %21 : vector<1x4x1x4x32xbf16> to vector<4x4x32xbf16>
    %23 = vector.shape_cast %20 : vector<4x4x32xbf16> to vector<1x4x1x4x32xbf16>
    tpu.vector_store %arg4[%c0_17, %c0_18, %c1_19, %c0_20, %c0_21], %23 {strides = array<i32>} : memref<1x4x2x4x32xbf16, #tpu.memory_space<vmem>>, vector<1x4x1x4x32xbf16>,
    return
  }
  func.func @transform_0(%arg0: i32) -> (i32, i32, i32) {
    %c0_i32 = arith.constant 0 : i32
    %c0_i32_0 = arith.constant 0 : i32
    %c0_i32_1 = arith.constant 0 : i32
    return %arg0, %c0_i32, %c0_i32_0 : i32, i32, i32
  }
  func.func @transform_1(%arg0: i32) -> (i32, i32, i32) {
    %c0_i32 = arith.constant 0 : i32
    %c0_i32_0 = arith.constant 0 : i32
    %c0_i32_1 = arith.constant 0 : i32
    %c0_i32_2 = arith.constant 0 : i32
    return %c0_i32, %c0_i32_0, %c0_i32_1 : i32, i32, i32
  }
  func.func @transform_2(%arg0: i32) -> (i32, i32) {
    %c0_i32 = arith.constant 0 : i32
    %c0_i32_0 = arith.constant 0 : i32
    %c0_i32_1 = arith.constant 0 : i32
    return %c0_i32, %c0_i32_0 : i32, i32
  }
  func.func @transform_3(%arg0: i32) -> (i32, i32, i32, i32, i32) {
    %c0_i32 = arith.constant 0 : i32
    %c0_i32_0 = arith.constant 0 : i32
    %c0_i32_1 = arith.constant 0 : i32
    %c0_i32_2 = arith.constant 0 : i32
    %c0_i32_3 = arith.constant 0 : i32
    return %arg0, %c0_i32, %c0_i32_0, %c0_i32_1, %c0_i32_2 : i32, i32, i32, i32, i32
  }
}

</mosaic_0001>

<bundles_post_ra>
// kernel: tpu_custom_call.1
= control target key start
LH: loop header
LB: loop body
LE: loop exit
PB: predicated region body
PF: predicated region fallthrough
CT: control target
= control target key end

     0   :  { %8 = vsyncpa [#allocation3], 0  ;;  %s1064_s0 = inlined_call_operand.hbm [shape: bf16[2,16,32], index: 0, kind: input, shape index: {}]   ;;  %s1065_s1 = inlined_call_operand.hbm [shape: bf16[2,32,32], index: 1, kind: input, shape index: {}]   ;;  %s1066_s2 = inlined_call_operand.hbm [shape: f32[1,32], index: 2, kind: input, shape index: {}]   ;;  %s1067_s3 = inlined_call_operand.hbm [shape: bf16[2,4,2,4,32], index: 3, kind: output, shape index: {}]  }
   0x1   :  { %10 = vsyncpa [#allocation3 + $0x1], 0 }
   0x2   :  { %11 = vsyncpa [#allocation6], 0 }
   0x3   :  { %12 = vsyncpa [#allocation4], 0 }
   0x4   :  { %14 = vsyncpa [#allocation4 + $0x1], 0  ;;  %s814_s12 = smov 0   ;;  %s816_s13 = smov 0  }
   0x5   :  { %s818_s14 = smov 0   ;;  %s820_s15 = smov 0  }
   0x6 LB: > { %s835_s16 = sadd.s32 4294967295, %s782_s15   ;;  %s493_s17 = sadd.s32 4294967294, %s782_s15   ;;  %s782_s15 = sphi %s820_s15, %s1087_s15   ;;  %s778_s14 = sphi %s818_s14, %s1086_s14   ;;  %s774_s13 = sphi %s816_s13, %s1085_s13   ;;  %s770_s12 = sphi %s814_s12, %s1084_s12  }
   0x7   : > { %p40_p0 = scmp.ne.s32.totalorder %s774_s13, %s770_s12  ;;  %p1068_p1 = scmp.eq.s32.totalorder %s835_s16, 0 }
   0x8   : > { %p112_p3 = scmp.eq.s32.totalorder %s493_s17, 1  ;;  %p494_p5 = scmp.ge.s32.totalorder %s782_s15, 1 }
   0x9   : > { %p844_p4 = por %p1068_p1, %p40_p0  ;;  %p119_p7 = scmp.lt.s32.totalorder %s782_s15, 3 }
   0xa   : > { %p849_p6 = por %p112_p3, %p40_p0  ;;  %s784_s21 = smov [#allocation5]  }
   0xb   : > { %s1071_s18 = scalar_select %p844_p4, 1, 0 }
   0xc   : > { %s1072_s19 = scalar_select %p849_p6, 1, 0 }
   0xd   : > { %p854_p8 = pnand %p494_p5, %p119_p7  ;;  %s131_s22 = sshll.u32 %s784_s21, 4  ;;  %s858_s22 = int_to_ptr.vmem [resolvable:$true] %s131_s22 }
   0xe   : > { %s785_s24 = smov [#allocation7]   ;;  %s626_s28 = scalar_lea.hbm %s1065_s1, 512 }
   0xf   : > { %p560_p9 = pneg %p854_p8  ;;  %s145_s25 = sshll.u32 %s785_s24, 4  ;;  %s869_s25 = int_to_ptr.vmem [resolvable:$true] %s145_s25 }
  0x10   : > { %p627_p12 = scmp.ne.s32.totalorder %s1065_s1, %s626_s28  ;;  %p633_p5 = scmp.lt.u32.totalorder %s626_s28, %s1065_s1 }
  0x11   : > { %p865_p11 = pnand %p560_p9, %p1068_p1 }
  0x13   : > { %p628_p13 = pneg %p865_p11 }
  0x15   : > { %p629_p0 = pnand %p628_p13, %p627_p12 }
  0x17   : > { %p630_p3 = pneg %p629_p0 }
  0x19   : > { %p635_p7 = pnand %p633_p5, %p630_p3 }
  0x1b   : > { %638 = shalt.err (!%p635_p7)
}
  0x1c   : > { %s639_s6 = scalar_lea.vmem %s858_s22, 512  ;;  %p647_p2 = scmp.lt.s32.totalorder %s858_s22, %s858_s22 }
  0x1d   : > { %p640_p9 = scmp.ne.s32.totalorder %s858_s22, %s639_s6  ;;  %p648_p12 = scmp.lt.s32.totalorder %s639_s6, %s639_s6 }
  0x1f   : > { %p642_p10 = pnand %p640_p9, %p628_p13  ;;  %p649_p0 = por %p648_p12, %p647_p2 }
  0x21   : > { %p643_p1 = pneg %p642_p10 }
  0x23   : > { %p650_p6 = pnand %p649_p0, %p643_p1 }
  0x25   : > { %653 = shalt.err (!%p650_p6)
}
  0x26   : > { %s786_s7 = smov 64   ;;  %s787_s8 = smov 4  }
  0x27   : > { %563 = dma.hbm_to_vmem [thread:$0]  (!%p865_p11), %s1065_s1, 512, %s858_s22, [#allocation6], %s786_s7, %s786_s7, %s787_s8  }
  0x28   : > { %s654_s21 = scalar_lea.hbm %s1066_s2, 16 }
  0x29   : > { %p655_p1 = scmp.ne.s32.totalorder %s1066_s2, %s654_s21  ;;  %p661_p10 = scmp.lt.u32.totalorder %s654_s21, %s1066_s2 }
  0x2b   : > { %p657_p2 = pnand %p655_p1, %p628_p13 }
  0x2d   : > { %p658_p6 = pneg %p657_p2 }
  0x2f   : > { %p663_p3 = pnand %p661_p10, %p658_p6 }
  0x31   : > { %666 = shalt.err (!%p663_p3)
}
  0x32   : > { %s667_s22 = scalar_lea.vmem %s869_s25, 16  ;;  %s674_s29 = scalar_lea.vmem %s869_s25, 32 }
  0x33   : > { %p668_p5 = scmp.ne.s32.totalorder %s869_s25, %s667_s22  ;;  %p675_p12 = scmp.lt.s32.totalorder %s869_s25, %s869_s25 }
  0x34   : > { %p676_p0 = scmp.lt.s32.totalorder %s674_s29, %s667_s22 }
  0x35   : > { %p670_p7 = pnand %p668_p5, %p628_p13 }
  0x36   : > { %p677_p1 = por %p676_p0, %p675_p12 }
  0x37   : > { %p671_p9 = pneg %p670_p7 }
  0x39   : > { %p678_p2 = pnand %p677_p1, %p671_p9 }
  0x3b   : > { %681 = shalt.err (!%p678_p2)
}
  0x3c   : > { %566 = dma.hbm_to_vmem [thread:$0]  (!%p865_p11), %s1066_s2, 16, %s869_s25, [#allocation6]  }
  0x3d   : > { %s928_s5 = sadd.s32 1, %s782_s15   ;;  %s27_s23 = sadd.s32 1, %s778_s14 }
  0x3e   : > { %s24_s6 = ssub.s32 %s782_s15, %s928_s5  ;;  %p34_p13 = scmp.ne.s32.totalorder %s778_s14, %s774_s13 }
  0x3f   : > { %p25_p6 = scmp.eq.s32.totalorder %s24_s6, 0  ;;  %p35_p10 = scmp.eq.s32.totalorder %s782_s15, 0 }
  0x40   : > { %p1075_p3 = scmp.eq.s32.totalorder %s835_s16, 1  ;;  %p577_p7 = scmp.lt.s32.totalorder %s782_s15, 2 }
  0x41   : > { %s944_s10 = scalar_select %p25_p6, %s778_s14, %s27_s23  }
  0x42   : > { %p938_p5 = por %p1075_p3, %p34_p13  ;;  %p36_p9 = por %p35_p10, %p34_p13 }
  0x43   : > { %s156_s11 = sand.u32 1, %s778_s14   ;;  %s524_s25 = sshll.u32 %s782_s15, 7 }
  0x44   : > { %s1076_s9 = scalar_select %p938_p5, 1, 0 }
  0x45   : > { %s498_s17 = sshll.u32 %s156_s11, 3  ;;  %s951_s26 = scalar_lea.hbm %s1064_s0, %s524_s25 }
  0x46   : > { %s160_s27 = scalar_lea.vmem [#allocation2], %s498_s17  ;;  %p955_p11 = pnand %p577_p7, %p36_p9 }
  0x47   : > { %s167_s28 = sshll.u32 %s160_s27, 4  ;;  %s959_s29 = scalar_lea.sflag [#allocation3], %s156_s11  ;;  %s953_s28 = int_to_ptr.vmem [resolvable:$true] %s167_s28 }
  0x48   : > { %s682_s30 = scalar_lea.hbm %s951_s26, 128  ;;  %p684_p0 = pneg %p955_p11 }
  0x49   : > { %p683_p12 = scmp.ne.s32.totalorder %s951_s26, %s682_s30  ;;  %s687_s6 = scalar_lea.hbm %s1064_s0, 256 }
  0x4a   : > { %p688_p13 = scmp.lt.u32.totalorder %s951_s26, %s1064_s0  ;;  %p689_p6 = scmp.lt.u32.totalorder %s687_s6, %s682_s30 }
  0x4b   : > { %p685_p1 = pnand %p684_p0, %p683_p12  ;;  %p691_p3 = scmp.lt.u32.totalorder %s682_s30, %s951_s26 }
  0x4c   : > { %p690_p10 = por %p689_p6, %p688_p13 }
  0x4d   : > { %p686_p2 = pneg %p685_p1 }
  0x4e   : > { %p692_p7 = por %p691_p3, %p690_p10 }
  0x50   : > { %p693_p9 = pnand %p692_p7, %p686_p2 }
  0x52   : > { %696 = shalt.err (!%p693_p9)
}
  0x53   : > { %s697_s11 = scalar_lea.vmem %s953_s28, 128  ;;  %s788_s21 = smov [#allocation2]  }
  0x54   : > { %p698_p12 = scmp.ne.s32.totalorder %s953_s28, %s697_s11  ;;  %s702_s24 = sshll.u32 %s788_s21, 4  ;;  %s703_s24 = int_to_ptr.vmem [resolvable:$false] %s702_s24 }
  0x55   : > { %s704_s27 = scalar_lea.vmem %s703_s24, 256  ;;  %p705_p4 = scmp.lt.s32.totalorder %s953_s28, %s703_s24 }
  0x56   : > { %p700_p1 = pnand %p698_p12, %p684_p0  ;;  %p706_p13 = scmp.lt.s32.totalorder %s704_s27, %s697_s11 }
  0x58   : > { %p701_p5 = pneg %p700_p1  ;;  %p707_p6 = por %p706_p13, %p705_p4 }
  0x5a   : > { %p708_p10 = pnand %p707_p6, %p701_p5 }
  0x5c   : > { %711 = shalt.err (!%p708_p10)
}
  0x5d   : > { %570 = dma.hbm_to_vmem [thread:$0]  (!%p955_p11), %s951_s26, 128, %s953_s28, %s959_s29, %s786_s7, %s786_s7, %s787_s8  }
  0x5e   : > { %179 = sbr.rel (%p854_p8) target bundleno = 351 (0x15f), region = 32  ;;  %s993_s30 = sand.u32 (!%p854_p8), 1, %s774_s13  }
  0x5f   : > { %s502_s4 = sshll.u32 (!%p854_p8), %s993_s30, 3  ;;  %s182_s23 = scalar_lea.sflag (!%p854_p8), [#allocation3], %s993_s30 }
  0x60   : > { %s185_s6 = scalar_lea.vmem (!%p854_p8), [#allocation2], %s502_s4  ;;  %p1078_p4 = scmp.ne.s32.totalorder (!%p854_p8), %s1071_s18, 0 }
  0x65   : > { %757 = dma.done.wait (%p1078_p4), %s182_s23, 128  }
  0x66   : > { %759 = vsyncadd (%p1078_p4), %s182_s23, 4294967168  ;;  %p1079_p5 = scmp.eq.s32.totalorder %s835_s16, 0 }
  0x68   : > { %761 = dma.done.wait (%p1079_p5), [#allocation6], 528   ;;  %p1080_p11 = pmov %p1079_p5 }
  0x69   : > { %v789_v0 = vmov 0.0   ;;  %vm790_vm0 = vmmov 0   ;;  %v621_v1 = vld [vmem:[#allocation5] sm:$0xff]   ;;  %v622_v2 = vld [vmem:[#allocation5 + $0x10] sm:$0xff]   ;;  %v623_v3 = vld [vmem:[#allocation5 + $0x8] sm:$0xff]   ;;  %vm247_vm1 = vcmask 261120  }
  0x6a   : > { %763 = vsyncadd (%p1080_p11), [#allocation6], 4294966768  ;;  %532 = vmatprep.subr.bf16.mxu0 %v789_v0  ;;  %540 = vmatprep.subr.bf16.mxu1 %v789_v0  ;;  %v624_v4 = vld [vmem:[#allocation5 + $0x18] sm:$0xff]   ;;  %v506_v6 = vld [vmem:[#allocation7] ss:$0 sm:$0xff]  ;;  %s505_s18 = sshll.u32 %s993_s30, 4 }
  0x6b   : > { %536 = vmatprep.mubr.msk.bf16.mxu0 %vm790_vm0, %v789_v0  ;;  %544 = vmatprep.mubr.msk.bf16.mxu1 %vm790_vm0, %v789_v0  ;;  %v625_v5 = vld [vmem:[%s185_s6] sm:$0xff]   ;;  %vm302_vm2 = vcmask 254976   ;;  %s525_s20 = sshll.u32 %s835_s16, 8  ;;  %s215_s7 = scalar_lea.vmem [#allocation8], %s505_s18 }
  0x6c   : > { %533 = vmatpush3.bf16.msra.mxu0 %v621_v1  ;;  %541 = vmatpush3.bf16.msra.mxu1 %v622_v2  ;;  %s401_s8 = sshll.u32 %s215_s7, 4  ;;  %s1014_s28 = scalar_lea.hbm %s1067_s3, %s525_s20  ;;  %s1016_s8 = int_to_ptr.vmem [resolvable:$true] %s401_s8 }
  0x6d   : > { %534 = vmatprep.subr.bf16.mxu0 %v789_v0  ;;  %542 = vmatprep.subr.bf16.mxu1 %v789_v0  ;;  %s388_s22 = scalar_lea.sflag [#allocation4], %s993_s30  ;;  %s712_s29 = scalar_lea.vmem %s1016_s8, 256 }
  0x6e   : > { %p713_p8 = scmp.ne.s32.totalorder %s1016_s8, %s712_s29  ;;  %p1081_p0 = scmp.ne.s32.totalorder %s1076_s9, 0 }
  0x6f   : > { %s791_s17 = smov [#allocation8]  }
  0x70   : > { %535 = vmatpush3.bf16.msra.mxu0 %v623_v3  ;;  %543 = vmatpush3.bf16.msra.mxu1 %v624_v4  ;;  %p714_p2 = pnand %p713_p8, %p1081_p0  ;;  %s716_s25 = sshll.u32 %s791_s17, 4  ;;  %s717_s25 = int_to_ptr.vmem [resolvable:$false] %s716_s25 }
  0x71   : > { %s718_s11 = scalar_lea.vmem %s717_s25, 512  ;;  %p719_p7 = scmp.lt.s32.totalorder %s1016_s8, %s717_s25 }
  0x72   : > { %p715_p3 = pneg %p714_p2  ;;  %p720_p9 = scmp.lt.s32.totalorder %s718_s11, %s712_s29 }
  0x73   : > { %537 = vmatmul.mubr.msk.bf16.vlgmr.msra.gmra.mrb[0].mxu0 %vm247_vm1, %v625_v5  ;;  %545 = vmatmul.mubr.msk.bf16.vlgmr.msra.gmra.mrb[0].mxu1 %vm247_vm1, %v625_v5 }
  0x74   : > { %p721_p12 = por %p720_p9, %p719_p7 }
  0x76   : > { %p722_p1 = pnand %p721_p12, %p715_p3 }
 0x146   : > { %v285_v7 = vpop.f32.mrb[0].mxu0  ;;  %v365_v9 = vpop.f32.mrb[0].mxu1 }
 0x147   : > { %v286_v8 = vadd.f32 %v506_v6, %v285_v7  ;;  %v538_v10 = vpop.f32.mrb[1].mxu0  ;;  %v366_v11 = vadd.f32 %v506_v6, %v365_v9  ;;  %v546_v12 = vpop.f32.mrb[1].mxu1 }
 0x148   : > { %v288_v13 = vpop.f32.mrb[2].mxu0  ;;  %v368_v17 = vpop.f32.mrb[2].mxu1 }
 0x149   : > { %v294_v14 = vcombine.high %v286_v8, %v286_v8  ;;  %v298_v15 = vpack.c.bf16 %v286_v8, %v286_v8  ;;  %v289_v16 = vadd.f32 %v506_v6, %v288_v13  ;;  %v539_v18 = vpop.f32.mrb[3].mxu0  ;;  %v374_v19 = vcombine.high %v366_v11, %v366_v11  ;;  %v547_v22 = vpop.f32.mrb[3].mxu1 }
 0x14a   : > { %v378_v20 = vpack.c.bf16 %v366_v11, %v366_v11  ;;  %v369_v21 = vadd.f32 %v506_v6, %v368_v17 }
 0x14b   : > { %v299_v23 = vpack.c.bf16 %v294_v14, %v294_v14  ;;  %303 = vst.msk [vmem:[%s215_s7] sm:$0x3] %vm302_vm2, %v298_v15  ;;  %v295_v24 = vcombine.high %v289_v16, %v289_v16  ;;  %v300_v25 = vpack.c.bf16 %v289_v16, %v289_v16  ;;  %v379_v26 = vpack.c.bf16 %v374_v19, %v374_v19 }
 0x14c   : > { %515 = vst.msk [vmem:[%s215_s7 + $0x2] sm:$0x3] %vm302_vm2, %v378_v20  ;;  %v375_v27 = vcombine.high %v369_v21, %v369_v21  ;;  %v380_v28 = vpack.c.bf16 %v369_v21, %v369_v21 }
 0x14d   : > { %304 = vst.msk [vmem:[%s215_s7 + $0x4] sm:$0x3] %vm302_vm2, %v299_v23  ;;  %v301_v29 = vpack.c.bf16 %v295_v24, %v295_v24  ;;  %305 = vst.msk [vmem:[%s215_s7 + $0x8] sm:$0x3] %vm302_vm2, %v300_v25 }
 0x14e   : > { %516 = vst.msk [vmem:[%s215_s7 + $0x6] sm:$0x3] %vm302_vm2, %v379_v26  ;;  %v381_v30 = vpack.c.bf16 %v375_v27, %v375_v27  ;;  %517 = vst.msk [vmem:[%s215_s7 + $0xa] sm:$0x3] %vm302_vm2, %v380_v28 }
 0x14f   : > { %306 = vst.msk [vmem:[%s215_s7 + $0xc] sm:$0x3] %vm302_vm2, %v301_v29 }
 0x150   : > { %518 = vst.msk [vmem:[%s215_s7 + $0xe] sm:$0x3] %vm302_vm2, %v381_v30 }
 0x151   : > { %725 = shalt.err (!%p722_p1)
}
 0x152   : > { %s726_s21 = scalar_lea.hbm %s1014_s28, 256  ;;  %s730_s4 = scalar_lea.hbm %s1067_s3, 512 }
 0x153   : > { %p727_p13 = scmp.ne.s32.totalorder %s1014_s28, %s726_s21  ;;  %p731_p4 = scmp.lt.u32.totalorder %s1014_s28, %s1067_s3 }
 0x154   : > { %p732_p5 = scmp.lt.u32.totalorder %s730_s4, %s726_s21  ;;  %p734_p8 = scmp.lt.u32.totalorder %s726_s21, %s1014_s28 }
 0x155   : > { %p728_p6 = pnand %p727_p13, %p1081_p0 }
 0x156   : > { %p733_p11 = por %p732_p5, %p731_p4 }
 0x157   : > { %p729_p10 = pneg %p728_p6 }
 0x158   : > { %p735_p2 = por %p734_p8, %p733_p11 }
 0x15a   : > { %p736_p3 = pnand %p735_p2, %p729_p10 }
 0x15c   : > { %739 = shalt.err (!%p736_p3)
}
 0x15d   : > { %s792_s18 = smov 32   ;;  %s793_s20 = smov 2  }
 0x15e   : > { %558 = dma.vmem_to_hbm [thread:$0]  (%p1081_p0), %s1016_s8, 256, %s1014_s28, %s388_s22, %s792_s18, %s792_s18, %s793_s20  }
 0x15f PF: > { %s416_s7 = sand.u32 1, %s770_s12   ;;  %p1082_p7 = scmp.ne.s32.totalorder %s1072_s19, 0 }
 0x160   : > { %p1083_p9 = scmp.ge.s32.totalorder %s782_s15, 2  ;;  %s417_s16 = scalar_lea.sflag [#allocation4], %s416_s7 }
 0x162   : > { %p572_p12 = pnand %p1083_p9, %p1082_p7 }
 0x164   : > { %765 = dma.done.wait (!%p572_p12), %s417_s16, 256  }
 0x165   : > { %767 = vsyncadd (!%p572_p12), %s417_s16, 4294967040  ;;  %p17_p1 = scmp.ge.s32.totalorder %s928_s5, 4   ;;  %s1084_s12 = smov %s774_s13 }
 0x166   : > { %s1085_s13 = smov %s778_s14  ;;  %s1086_s14 = smov %s944_s10 }
 0x167   : > { %s1087_s15 = smov %s928_s5  ;;  %19 = sbr.rel (!%p17_p1) target bundleno = 6 (0x6), region = 87 }
 0x16e   :  { %422 = vsyncpa [#allocation3], 1 }
 0x16f   :  { %424 = vsyncpa [#allocation3 + $0x1], 1 }
 0x170   :  { %425 = vsyncpa [#allocation6], 1 }
 0x171   :  { %426 = vsyncpa [#allocation4], 1 }
 0x172   :  { %428 = vsyncpa [#allocation4 + $0x1], 1 }

</bundles_post_ra>
